<compile_context>
chip_gen: v7x
topology: tpu7x:2x2x1
jax: 0.10.0
libtpu: 0.0.40
codegen_flags: <defaults>
</compile_context>

<pallas_src>
import functools

import jax
import jax.numpy as jnp
from jax import lax
from jax.experimental import pallas as pl
from jax.experimental.pallas import tpu as pltpu

_SQRT_HALF = 0.7071067811865476  # 1/sqrt(2), hoisted constant


def _round_up(v, m):
    return (v + m - 1) // m * m


def _gelu_exact(h):
    # torch.nn.GELU() default = exact erf formulation (computed in f32).
    return 0.5 * h * (1.0 + lax.erf(h * _SQRT_HALF))


def _single_chunk_kernel(te_ref, x_ref, w1_ref, b1_ref, w2_ref, b2_ref, o_ref):
    # Whole hid fits in one VMEM block: no accumulator, one store per tile.
    del te_ref  # consumed only by the index_maps
    h = jnp.dot(x_ref[...], w1_ref[...], preferred_element_type=jnp.float32)
    h = _gelu_exact(h + b1_ref[...])
    y = jnp.dot(h.astype(w2_ref.dtype), w2_ref[...],
                preferred_element_type=jnp.float32)
    o_ref[...] = (y + b2_ref[...]).astype(o_ref.dtype)


def _chunked_kernel(te_ref, x_ref, w1_ref, b1_ref, w2_ref, b2_ref, o_ref,
                    acc_ref):
    # hid streamed in chunks on grid axis 1 ("arbitrary").  GELU per chunk is
    # exact because in_f is fully contracted within a visit; y accumulates in
    # the resident f32 scratch and is stored to HBM only on the last chunk.
    del te_ref
    c = pl.program_id(1)

    h = jnp.dot(x_ref[...], w1_ref[...], preferred_element_type=jnp.float32)
    h = _gelu_exact(h + b1_ref[...])
    y = jnp.dot(h.astype(w2_ref.dtype), w2_ref[...],
                preferred_element_type=jnp.float32)

    @pl.when(c == 0)
    def _():
        acc_ref[...] = y + b2_ref[...]

    @pl.when(c > 0)
    def _():
        acc_ref[...] += y

    @pl.when(c == pl.num_programs(1) - 1)
    def _():
        o_ref[...] = acc_ref[...].astype(o_ref.dtype)


@functools.partial(
    jax.jit,
    static_argnames=("tm", "compute_dtype", "vmem_limit_bytes", "hid_chunk"))
def moe_runtime_experts(x, indices_s, weight1, bias1, weight2, bias2, *,
                        tm=128, compute_dtype=jnp.bfloat16,
                        vmem_limit_bytes=48 * 1024 * 1024, hid_chunk=None):
    """x: (T, in_features), indices_s: (T,) int32 expert ids.

    Returns (T, 1, out_features), matching the PyTorch forward output.
    """
    T, in_f = x.shape
    E, _, hid = weight1.shape
    out_f = weight2.shape[2]
    assert bias1.shape == (E, hid)
    assert bias2.shape == (E, out_f) and out_f == in_f, \
        "module's bias2 shape (E, in_features) implies out_features == in_features"
    assert tm % 8 == 0

    # ---------------- lane-dense padded feature dims ----------------
    in_fp = _round_up(in_f, 128)
    out_fp = _round_up(out_f, 128)
    itemsize = jnp.dtype(compute_dtype).itemsize
    hid128 = _round_up(hid, 128)

    # ------------- hid chunk sized to the VMEM budget -------------
    if hid_chunk is not None:
        hid_c = min(_round_up(hid_chunk, 128), hid128)
        n_chunks = -(-hid128 // hid_c)
    else:
        budget = int(vmem_limit_bytes * 0.75)  # headroom for pipeline bookkeeping
        fixed = 2 * itemsize * (tm * in_fp + tm * out_fp + out_fp) \
            + 4 * tm * out_fp
        per_hc = 2 * itemsize * (in_fp + out_fp + 1)  # dbl-buffered W1 col + W2 row + b1
        max_hc = max(128, (budget - fixed) // per_hc // 128 * 128)
        if max_hc >= hid128:
            hid_c, n_chunks = hid128, 1
        else:
            n_chunks = -(-hid128 // max_hc)
            hid_c = _round_up(-(-hid128 // n_chunks), 128)
    hid_p = hid_c * n_chunks

    # ------- expert sort + group alignment (each TM tile owned by one expert) -------
    n_tiles = pl.cdiv(T, tm) + E          # static upper bound on group-padded tiles
    t_alloc = n_tiles * tm

    idx = indices_s.astype(jnp.int32)
    order = jnp.argsort(idx)
    inv_order = jnp.argsort(order)
    sorted_idx = idx[order]
    group_sizes = jnp.bincount(sorted_idx, length=E)
    group_start = jnp.cumsum(group_sizes) - group_sizes
    padded_sizes = ((group_sizes + tm - 1) // tm) * tm
    padded_end = jnp.cumsum(padded_sizes)
    padded_start = padded_end - padded_sizes

    pos = jnp.arange(T, dtype=jnp.int32)
    dest_sorted = padded_start[sorted_idx] + (pos - group_start[sorted_idx])
    dest = dest_sorted[inv_order]          # original token -> group-aligned row

    # Per-tile expert id (scalar prefetch).  Trailing unused tiles reuse the
    # last expert's weights (no extra DMA); their rows / group-pad rows are
    # zeros that run through the MLP and are never read back -- wasted compute
    # bounded by < E*TM rows, NOT a bug.
    cum_tiles = padded_end // tm
    tile_ids = jnp.arange(n_tiles, dtype=jnp.int32)
    tile_expert = jnp.minimum(
        jnp.searchsorted(cum_tiles, tile_ids, side="right"), E - 1
    ).astype(jnp.int32)

    # ------- single fused activation pass: cast + feature-pad + scatter -------
    xc = jnp.pad(x, ((0, 0), (0, in_fp - in_f))).astype(compute_dtype)
    xs = jnp.zeros((t_alloc, in_fp), compute_dtype).at[dest].set(xc)

    # ------- weights/biases: lane-dense padding, bf16 weights, f32 biases -------
    w1c = jnp.pad(weight1, ((0, 0), (0, in_fp - in_f), (0, hid_p - hid))
                  ).astype(compute_dtype)
    w2c = jnp.pad(weight2, ((0, 0), (0, hid_p - hid), (0, out_fp - out_f))
                  ).astype(compute_dtype)
    b1r = jnp.pad(bias1, ((0, 0), (0, hid_p - hid))
                  ).reshape(E, 1, hid_p).astype(jnp.float32)
    b2r = jnp.pad(bias2, ((0, 0), (0, out_fp - out_f))
                  ).reshape(E, 1, out_fp).astype(jnp.float32)

    flops = 2 * t_alloc * in_fp * hid_p + 2 * t_alloc * hid_p * out_fp
    bytes_accessed = (
        n_tiles * n_chunks * (in_fp * hid_c + hid_c * out_fp) * itemsize
        + t_alloc * (in_fp + out_fp) * itemsize
        + E * (hid_p + out_fp) * 4)
    cost = pl.CostEstimate(flops=flops, transcendentals=t_alloc * hid_p,
                           bytes_accessed=bytes_accessed)

    compiler_params = pltpu.CompilerParams(
        dimension_semantics=(("parallel",) if n_chunks == 1
                             else ("parallel", "arbitrary")),
        vmem_limit_bytes=vmem_limit_bytes)

    if n_chunks == 1:
        grid_spec = pltpu.PrefetchScalarGridSpec(
            num_scalar_prefetch=1,
            grid=(n_tiles,),
            in_specs=[
                pl.BlockSpec((tm, in_fp), lambda t, te: (t, 0)),              # x tile
                pl.BlockSpec((None, in_fp, hid_p), lambda t, te: (te[t], 0, 0)),   # W1[e]
                pl.BlockSpec((None, 1, hid_p), lambda t, te: (te[t], 0, 0)),       # b1[e]
                pl.BlockSpec((None, hid_p, out_fp), lambda t, te: (te[t], 0, 0)),  # W2[e]
                pl.BlockSpec((None, 1, out_fp), lambda t, te: (te[t], 0, 0)),      # b2[e]
            ],
            out_specs=pl.BlockSpec((tm, out_fp), lambda t, te: (t, 0)),
        )
        kernel = _single_chunk_kernel
    else:
        grid_spec = pltpu.PrefetchScalarGridSpec(
            num_scalar_prefetch=1,
            grid=(n_tiles, n_chunks),          # hid (reduction-like) axis last
            in_specs=[
                pl.BlockSpec((tm, in_fp), lambda t, c, te: (t, 0)),
                pl.BlockSpec((None, in_fp, hid_c), lambda t, c, te: (te[t], 0, c)),
                pl.BlockSpec((None, 1, hid_c), lambda t, c, te: (te[t], 0, c)),
                pl.BlockSpec((None, hid_c, out_fp), lambda t, c, te: (te[t], c, 0)),
                pl.BlockSpec((None, 1, out_fp), lambda t, c, te: (te[t], 0, 0)),
            ],
            out_specs=pl.BlockSpec((tm, out_fp), lambda t, c, te: (t, 0)),
            scratch_shapes=[pltpu.VMEM((tm, out_fp), jnp.float32)],
        )
        kernel = _chunked_kernel

    out = pl.pallas_call(
        kernel,
        out_shape=jax.ShapeDtypeStruct((t_alloc, out_fp), x.dtype),
        grid_spec=grid_spec,
        compiler_params=compiler_params,
        cost_estimate=cost,
    )(tile_expert, xs, w1c, b1r, w2c, b2r)

    # Single gather unsorts + drops group padding; slice drops feature padding.
    y = jnp.take(out, dest, axis=0)[:, :out_f]
    return y.reshape(T, 1, out_f)


def _reference(x, indices_s, weight1, bias1, weight2, bias2, compute_dtype=None):
    """Plain-JAX reference matching the PyTorch forward (optionally with the
    same low-precision-inputs / f32-accumulation path as the kernel)."""
    if compute_dtype is not None:
        xc = x.astype(compute_dtype)
        w1 = weight1.astype(compute_dtype)
        w2 = weight2.astype(compute_dtype)
    else:
        xc, w1, w2 = x, weight1, weight2
    xb = xc[:, None, :]                                    # (T, 1, in)
    h = jnp.einsum('tli,tih->tlh', xb, w1[indices_s],
                   preferred_element_type=jnp.float32)
    h = h + bias1[indices_s][:, None, :].astype(jnp.float32)
    h = _gelu_exact(h)
    if compute_dtype is not None:
        h = h.astype(compute_dtype)
    y = jnp.einsum('tlh,tho->tlo', h, w2[indices_s],
                   preferred_element_type=jnp.float32)
    y = y + bias2[indices_s][:, None, :].astype(jnp.float32)
    return y.astype(x.dtype)


if __name__ == "__main__":
    # Small shapes consistent with the module (lane-dense feature dims).
    num_experts = 4
    in_features = 128
    hidden_features = 256
    out_features = in_features   # required by bias2's shape in the module
    num_tokens = 24

    key = jax.random.PRNGKey(0)
    k_w1, k_w2, k_b1, k_b2, k_x, k_idx = jax.random.split(key, 6)

    # torch.rand -> uniform [0, 1)
    weight1 = jax.random.uniform(
        k_w1, (num_experts, in_features, hidden_features), dtype=jnp.float32)
    weight2 = jax.random.uniform(
        k_w2, (num_experts, hidden_features, out_features), dtype=jnp.float32)
    bias1 = jax.random.uniform(k_b1, (num_experts, hidden_features), dtype=jnp.float32)
    bias2 = jax.random.uniform(k_b2, (num_experts, in_features), dtype=jnp.float32)

    x = jax.random.uniform(k_x, (num_tokens, in_features), dtype=jnp.float32)
    indices_s = jax.random.randint(k_idx, (num_tokens,), 0, num_experts,
                                   dtype=jnp.int32)

    ref32 = _reference(x, indices_s, weight1, bias1, weight2, bias2)
    refbf = _reference(x, indices_s, weight1, bias1, weight2, bias2,
                       compute_dtype=jnp.bfloat16)

    def rel_err(a, b):
        a = jnp.asarray(a, jnp.float32)
        b = jnp.asarray(b, jnp.float32)
        return float(jnp.max(jnp.abs(a - b) / (jnp.abs(b) + 1.0)))

    # (1) f32, small tile (multiple tiles per expert group), single hid chunk.
    y32 = jax.block_until_ready(moe_runtime_experts(
        x, indices_s, weight1, bias1, weight2, bias2,
        tm=16, compute_dtype=jnp.float32))
    assert y32.shape == (num_tokens, 1, out_features)
    assert jnp.allclose(y32, ref32, atol=1e-2, rtol=1e-3), \
        "f32 single-chunk mismatch vs reference"

    # (2) f32 with hid streamed in 2 chunks (exercises the chunked-reduction kernel).
    y32c = jax.block_until_ready(moe_runtime_experts(
        x, indices_s, weight1, bias1, weight2, bias2,
        tm=16, compute_dtype=jnp.float32, hid_chunk=128))
    assert jnp.allclose(y32c, ref32, atol=1e-2, rtol=1e-3), \
        "f32 chunked mismatch vs reference"

    # (3) bf16 fast path, default TM=128, relative-error check against a
    #     precision-matched reference.
    ybf = jax.block_until_ready(moe_runtime_experts(
        x, indices_s, weight1, bias1, weight2, bias2,
        compute_dtype=jnp.bfloat16))
    assert rel_err(ybf, refbf) < 2e-2, "bf16 mismatch vs precision-matched reference"

    print("KERNEL_OK")
</pallas_src>

<mosaic_0001>
module attributes {stable_mosaic.version = 11 : i64} {
  func.func @_single_chunk_kernel(%arg0: i32, %arg1: memref<6xi32, #tpu.memory_space<smem>>, %arg2: memref<16x128xf32, #tpu.memory_space<vmem>>, %arg3: memref<1x128x256xf32, #tpu.memory_space<vmem>>, %arg4: memref<1x1x256xf32, #tpu.memory_space<vmem>>, %arg5: memref<1x256x128xf32, #tpu.memory_space<vmem>>, %arg6: memref<1x1x128xf32, #tpu.memory_space<vmem>>, %arg7: memref<16x128xf32, #tpu.memory_space<vmem>>) attributes {dimension_semantics = [#tpu.dimension_semantics<parallel>], iteration_bounds = array<i64: 6>, scalar_prefetch = 1 : i64, scratch_operands = 0 : i64, tpu.core_type = #tpu.core_type<tc>, window_params = [{transform_indices = @transform_0, window_bounds = array<i64: 16, 128>}, {transform_indices = @transform_1, window_bounds = array<i64: 1, 128, 256>}, {transform_indices = @transform_2, window_bounds = array<i64: 1, 1, 256>}, {transform_indices = @transform_3, window_bounds = array<i64: 1, 256, 128>}, {transform_indices = @transform_4, window_bounds = array<i64: 1, 1, 128>}, {transform_indices = @transform_5, window_bounds = array<i64: 16, 128>}]} {
    %c0 = arith.constant 0 : index
    %c0_0 = arith.constant 0 : index
    %0 = vector.load %arg2[%c0, %c0_0] : memref<16x128xf32, #tpu.memory_space<vmem>>, vector<16x128xf32>
    %c0_1 = arith.constant 0 : index
    %c0_2 = arith.constant 0 : index
    %c0_3 = arith.constant 0 : index
    %1 = vector.load %arg3[%c0_1, %c0_2, %c0_3] : memref<1x128x256xf32, #tpu.memory_space<vmem>>, vector<1x128x256xf32>
    %2 = vector.shape_cast %1 : vector<1x128x256xf32> to vector<128x256xf32>
    %cst = arith.constant dense<0.000000e+00> : vector<16x256xf32>
    %3 = tpu.matmul %0, %2, %cst {dimension_numbers = #tpu.dot_dimension_numbers<[1], [0], [0], [1], [0, 0, 1, 1], [], []>} : vector<16x128xf32>, vector<128x256xf32>, vector<16x256xf32> -> vector<16x256xf32>
    %c0_4 = arith.constant 0 : index
    %c0_5 = arith.constant 0 : index
    %c0_6 = arith.constant 0 : index
    %4 = vector.load %arg4[%c0_4, %c0_5, %c0_6] : memref<1x1x256xf32, #tpu.memory_space<vmem>>, vector<1x1x256xf32>
    %5 = vector.shape_cast %4 : vector<1x1x256xf32> to vector<1x256xf32>
    %6 = vector.broadcast %5 : vector<1x256xf32> to vector<16x256xf32>
    %7 = arith.addf %3, %6 : vector<16x256xf32>
    %cst_7 = arith.constant 5.000000e-01 : f32
    %8 = vector.broadcast %cst_7 : f32 to vector<16x256xf32>
    %9 = arith.mulf %8, %7 : vector<16x256xf32>
    %cst_8 = arith.constant 0.707106769 : f32
    %10 = vector.broadcast %cst_8 : f32 to vector<16x256xf32>
    %11 = arith.mulf %7, %10 : vector<16x256xf32>
    %12 = math.erf %11 : vector<16x256xf32>
    %cst_9 = arith.constant 1.000000e+00 : f32
    %13 = vector.broadcast %cst_9 : f32 to vector<16x256xf32>
    %14 = arith.addf %13, %12 : vector<16x256xf32>
    %15 = arith.mulf %9, %14 : vector<16x256xf32>
    %c0_10 = arith.constant 0 : index
    %c0_11 = arith.constant 0 : index
    %c0_12 = arith.constant 0 : index
    %16 = vector.load %arg5[%c0_10, %c0_11, %c0_12] : memref<1x256x128xf32, #tpu.memory_space<vmem>>, vector<1x256x128xf32>
    %17 = vector.shape_cast %16 : vector<1x256x128xf32> to vector<256x128xf32>
    %cst_13 = arith.constant dense<0.000000e+00> : vector<16x128xf32>
    %18 = tpu.matmul %15, %17, %cst_13 {dimension_numbers = #tpu.dot_dimension_numbers<[1], [0], [0], [1], [0, 0, 1, 1], [], []>} : vector<16x256xf32>, vector<256x128xf32>, vector<16x128xf32> -> vector<16x128xf32>
    %c0_14 = arith.constant 0 : index
    %c0_15 = arith.constant 0 : index
    %c0_16 = arith.constant 0 : index
    %19 = vector.load %arg6[%c0_14, %c0_15, %c0_16] : memref<1x1x128xf32, #tpu.memory_space<vmem>>, vector<1x1x128xf32>
    %20 = vector.shape_cast %19 : vector<1x1x128xf32> to vector<1x128xf32>
    %21 = vector.broadcast %20 : vector<1x128xf32> to vector<16x128xf32>
    %22 = arith.addf %18, %21 : vector<16x128xf32>
    %c0_17 = arith.constant 0 : index
    %c0_18 = arith.constant 0 : index
    %23 = vector.load %arg7[%c0_17, %c0_18] : memref<16x128xf32, #tpu.memory_space<vmem>>, vector<16x128xf32>
    tpu.vector_store %arg7[%c0_17, %c0_18], %22 {strides = array<i32>} : memref<16x128xf32, #tpu.memory_space<vmem>>, vector<16x128xf32>,
    return
  }
  func.func @transform_0(%arg0: i32, %arg1: memref<6xi32, #tpu.memory_space<smem>>) -> (i32, i32) {
    %c0_i32 = arith.constant 0 : i32
    %c0_i32_0 = arith.constant 0 : i32
    return %arg0, %c0_i32 : i32, i32
  }
  func.func @transform_1(%arg0: i32, %arg1: memref<6xi32, #tpu.memory_space<smem>>) -> (i32, i32, i32) {
    %0 = arith.index_cast %arg0 : i32 to index
    %1 = memref.load %arg1[%0] : memref<6xi32, #tpu.memory_space<smem>>
    %c0_i32 = arith.constant 0 : i32
    %c0_i32_0 = arith.constant 0 : i32
    %c0_i32_1 = arith.constant 0 : i32
    return %1, %c0_i32, %c0_i32_0 : i32, i32, i32
  }
  func.func @transform_2(%arg0: i32, %arg1: memref<6xi32, #tpu.memory_space<smem>>) -> (i32, i32, i32) {
    %0 = arith.index_cast %arg0 : i32 to index
    %1 = memref.load %arg1[%0] : memref<6xi32, #tpu.memory_space<smem>>
    %c0_i32 = arith.constant 0 : i32
    %c0_i32_0 = arith.constant 0 : i32
    %c0_i32_1 = arith.constant 0 : i32
    return %1, %c0_i32, %c0_i32_0 : i32, i32, i32
  }
  func.func @transform_3(%arg0: i32, %arg1: memref<6xi32, #tpu.memory_space<smem>>) -> (i32, i32, i32) {
    %0 = arith.index_cast %arg0 : i32 to index
    %1 = memref.load %arg1[%0] : memref<6xi32, #tpu.memory_space<smem>>
    %c0_i32 = arith.constant 0 : i32
    %c0_i32_0 = arith.constant 0 : i32
    %c0_i32_1 = arith.constant 0 : i32
    return %1, %c0_i32, %c0_i32_0 : i32, i32, i32
  }
  func.func @transform_4(%arg0: i32, %arg1: memref<6xi32, #tpu.memory_space<smem>>) -> (i32, i32, i32) {
    %0 = arith.index_cast %arg0 : i32 to index
    %1 = memref.load %arg1[%0] : memref<6xi32, #tpu.memory_space<smem>>
    %c0_i32 = arith.constant 0 : i32
    %c0_i32_0 = arith.constant 0 : i32
    %c0_i32_1 = arith.constant 0 : i32
    return %1, %c0_i32, %c0_i32_0 : i32, i32, i32
  }
  func.func @transform_5(%arg0: i32, %arg1: memref<6xi32, #tpu.memory_space<smem>>) -> (i32, i32) {
    %c0_i32 = arith.constant 0 : i32
    %c0_i32_0 = arith.constant 0 : i32
    return %arg0, %c0_i32 : i32, i32
  }
}

</mosaic_0001>

<bundles_post_ra>
// kernel: custom-call
= control target key start
LH: loop header
LB: loop body
LE: loop exit
PB: predicated region body
PF: predicated region fallthrough
CT: control target
= control target key end

     0   :  { %s6_s0 = inlined_call_operand.vmem [shape: u32[6], index: 0, kind: output, shape index: {}]  }

// kernel: moe_runtime_experts.1
= control target key start
LH: loop header
LB: loop body
LE: loop exit
PB: predicated region body
PF: predicated region fallthrough
CT: control target
= control target key end

     0   :  { %s1008_s0 = inlined_call_operand.vmem [shape: s32[6], index: 0, kind: input, shape index: {}]   ;;  %s1009_s1 = inlined_call_operand.vmem [shape: f32[96,128], index: 1, kind: input, shape index: {}]   ;;  %s1010_s2 = inlined_call_operand.vmem [shape: f32[4,128,256], index: 2, kind: input, shape index: {}]   ;;  %s1011_s3 = inlined_call_operand.vmem [shape: f32[4,1,256], index: 3, kind: input, shape index: {}]   ;;  %s1012_s4 = inlined_call_operand.vmem [shape: f32[4,256,128], index: 4, kind: input, shape index: {}]   ;;  %s1013_s5 = inlined_call_operand.vmem [shape: f32[4,1,128], index: 5, kind: input, shape index: {}]   ;;  %s1014_s6 = inlined_call_operand.vmem [shape: f32[96,128], index: 6, kind: output, shape index: {}]  }
   0x1   :  { %s11_s23 = sshll.u32 %s1008_s0, 4  ;;  %s12_s23 = int_to_ptr.vmem [resolvable:$true] %s11_s23 }
   0x2   :  { %s833_s24 = scalar_lea.vmem %s12_s23, 16  ;;  %p838_p1 = scmp.lt.s32.totalorder %s12_s23, %s12_s23 }
   0x3   :  { %p834_p0 = scmp.ne.s32.totalorder %s12_s23, %s833_s24  ;;  %p839_p2 = scmp.lt.s32.totalorder %s833_s24, %s833_s24 }
   0x5   :  { %p840_p3 = por %p839_p2, %p838_p1 }
   0x7   :  { %p841_p4 = pnand %p840_p3, %p834_p0 }
   0x9   :  { %844 = shalt.err (!%p841_p4)  }
   0xa   :  { %s855_s25 = smov [#allocation3]  }
   0xb   :  { %14 = dma.vmem_to_smem %s12_s23, 16, %s855_s25, [#allocation2] }
   0xc   :  { %849 = dma.done.wait [#allocation2], 16 }
   0xd   :  { %850 = vsyncadd [#allocation2], 4294967280 }
   0xe   :  { %16 = sfence }
   0xf   :  { %s895_s26 = smov 0  }
  0x10 LB: > { %s901_s0 = sadd.s32 4294967295, %s853_s26   ;;  %p698_p5 = scmp.ge.s32.totalorder %s853_s26, 1  ;;  %s853_s26 = sphi %s895_s26, %s22_s26  }
  0x11   : > { %p248_p6 = scmp.lt.s32.totalorder %s853_s26, 7 }
  0x13   : > { %p249_p7 = pnand %p698_p5, %p248_p6 }
  0x14   : > { %s303_s27 = sld [smem:[#allocation3 + %s901_s0]] (!%p249_p7)  ;;  %v856_v0 = vmov (!%p249_p7), 0.0   ;;  %s699_s13 = sshll.u32 (!%p249_p7), %s901_s0, 1 }
  0x15   : > { %252 = sbr.rel (%p249_p7) target bundleno = 521 (0x209), region = 40  ;;  %444 = vmatprep.mubr.f32.mxu0 (!%p249_p7), %v856_v0  ;;  %s316_s28 = sld [smem:[#allocation3 + %s901_s0]] (!%p249_p7) }
  0x16   : > { %p298_p10 = scmp.lt.s32.totalorder (!%p249_p7), %s699_s13, 11  ;;  %s310_s18 = sld [smem:[#allocation3 + %s901_s0]] (!%p249_p7) }
  0x17   : > { %s323_s23 = sld [smem:[#allocation3 + %s901_s0]] (!%p249_p7) }
  0x1a   : > { %p304_p8 = scmp.lt.s32.totalorder (!%p249_p7), %s303_s27, 3 }
  0x1b   : > { %p317_p9 = scmp.lt.s32.totalorder (!%p249_p7), %s316_s28, 3 }
  0x1c   : > { %s1016_s27 = smov (!%p304_p8, %s303_s27), 3  ;;  %s1020_s13 = smov (!%p298_p10, %s699_s13), 11 }
  0x1d   : > { %s711_s29 = sshll.u32 %s1016_s27, 8  ;;  %s1018_s28 = smov (!%p317_p9, %s316_s28), 3 }
  0x1e   : > { %s911_s8 = scalar_lea.vmem %s1010_s2, %s711_s29  ;;  %s712_s9 = sshll.u32 %s1018_s28, 8 }
  0x1f   : > { %v337_v1 = vld [vmem:[%s911_s8 + $0x8] sm:$0xff]  ;;  %v339_v2 = vld [vmem:[%s911_s8 + $0x18] sm:$0xff]  ;;  %v336_v3 = vld [vmem:[%s911_s8] sm:$0xff]  ;;  %s930_s12 = scalar_lea.vmem %s1012_s4, %s712_s9  ;;  %s700_s14 = sshll.u32 %s1020_s13, 3 }
  0x20   : > { %v751_v4 = vpack.c.bf16 %v339_v2, %v337_v1  ;;  %v338_v5 = vld [vmem:[%s911_s8 + $0x10] sm:$0xff]  ;;  %v341_v6 = vld [vmem:[%s911_s8 + $0x28] sm:$0xff]  ;;  %v343_v7 = vld [vmem:[%s911_s8 + $0x38] sm:$0xff]  ;;  %s301_s17 = scalar_lea.vmem %s1009_s1, %s700_s14  ;;  %p311_p11 = scmp.lt.s32.totalorder %s310_s18, 3 }
  0x21   : > { %v753_v8 = vpack.c.bf16 %v338_v5, %v336_v3  ;;  %v755_v9 = vpack.c.bf16 %v343_v7, %v341_v6  ;;  %v340_v10 = vld [vmem:[%s911_s8 + $0x20] sm:$0xff]  ;;  %v342_v11 = vld [vmem:[%s911_s8 + $0x30] sm:$0xff]  ;;  %v345_v12 = vld [vmem:[%s911_s8 + $0x48] sm:$0xff]  ;;  %p324_p12 = scmp.lt.s32.totalorder %s323_s23, 3  ;;  %s332_s30 = scalar_lea.vmem %s1014_s6, %s700_s14 }
  0x22   : > { %752 = vmatprep.subr.bf16.mxu0 %v751_v4  ;;  %v347_v13 = vld [vmem:[%s911_s8 + $0x58] sm:$0xff]  ;;  %v757_v14 = vpack.c.bf16 %v342_v11, %v340_v10  ;;  %v344_v16 = vld [vmem:[%s911_s8 + $0x40] sm:$0xff]  ;;  %v346_v17 = vld [vmem:[%s911_s8 + $0x50] sm:$0xff]  ;;  %s1022_s18 = smov (!%p311_p11, %s310_s18), 3 }
  0x23   : > { %754 = vmatpush1.bf16.msra.mxu0 %v753_v8  ;;  %v759_v15 = vpack.c.bf16 %v347_v13, %v345_v12  ;;  %v349_v18 = vld [vmem:[%s911_s8 + $0x68] sm:$0xff]  ;;  %v351_v19 = vld [vmem:[%s911_s8 + $0x78] sm:$0xff]  ;;  %v761_v20 = vpack.c.bf16 %v346_v17, %v344_v16  ;;  %v348_v22 = vld [vmem:[%s911_s8 + $0x60] sm:$0xff]  ;;  %s703_s19 = sshll.u32 %s1022_s18, 1  ;;  %s1024_s23 = smov (!%p324_p12, %s323_s23), 3 }
  0x24   : > { %756 = vmatprep.subr.bf16.mxu0 %v755_v9  ;;  %v763_v21 = vpack.c.bf16 %v351_v19, %v349_v18  ;;  %v350_v23 = vld [vmem:[%s911_s8 + $0x70] sm:$0xff]  ;;  %v353_v24 = vld [vmem:[%s911_s8 + $0x88] sm:$0xff]  ;;  %v355_v25 = vld [vmem:[%s911_s8 + $0x98] sm:$0xff]  ;;  %s314_s22 = scalar_lea.vmem %s1011_s3, %s703_s19  ;;  %s326_s27 = scalar_lea.vmem %s1013_s5, %s1024_s23 }
  0x25   : > { %v493_v26 = vld [vmem:[%s930_s12 + $0x80] sm:$0xff]  ;;  %v354_v28 = vld [vmem:[%s911_s8 + $0x90] sm:$0xff]  ;;  %v494_v29 = vld [vmem:[%s930_s12 + $0x88] sm:$0xff]  ;;  %v765_v32 = vpack.c.bf16 %v350_v23, %v348_v22  ;;  %v767_v38 = vpack.c.bf16 %v355_v25, %v353_v24 }
  0x26   : > { %v352_v27 = vld [vmem:[%s911_s8 + $0x80] sm:$0xff]  ;;  %v478_v31 = vld [vmem:[%s930_s12 + $0x8] sm:$0xff]  ;;  %v783_v33 = vpack.c.bf16 %v494_v29, %v493_v26  ;;  %v495_v35 = vld [vmem:[%s930_s12 + $0x90] sm:$0xff] }
  0x27   : > { %758 = vmatpush1.bf16.msra.mxu0 %v757_v14  ;;  %v477_v30 = vld [vmem:[%s930_s12] sm:$0xff]  ;;  %v496_v36 = vld [vmem:[%s930_s12 + $0x98] sm:$0xff]  ;;  %v479_v37 = vld [vmem:[%s930_s12 + $0x10] sm:$0xff]  ;;  %v769_v46 = vpack.c.bf16 %v354_v28, %v352_v27 }
  0x28   : > { %760 = vmatprep.subr.bf16.mxu0 %v759_v15  ;;  %v785_v34 = vpack.c.bf16 %v478_v31, %v477_v30  ;;  %v787_v39 = vpack.c.bf16 %v496_v36, %v495_v35  ;;  %v480_v40 = vld [vmem:[%s930_s12 + $0x18] sm:$0xff]  ;;  %v497_v41 = vld [vmem:[%s930_s12 + $0xa0] sm:$0xff]  ;;  %v498_v42 = vld [vmem:[%s930_s12 + $0xa8] sm:$0xff]  ;;  %784 = vmatprep.subr.bf16.mxu1 %v783_v33  ;;  %v370_v35 = vlaneseq }
  0x29   : > { %v357_v43 = vld [vmem:[%s911_s8 + $0xa8] sm:$0xff]  ;;  %v359_v44 = vld [vmem:[%s911_s8 + $0xb8] sm:$0xff]  ;;  %v789_v45 = vpack.c.bf16 %v480_v40, %v479_v37  ;;  %v791_v47 = vpack.c.bf16 %v498_v42, %v497_v41  ;;  %v481_v48 = vld [vmem:[%s930_s12 + $0x20] sm:$0xff] }
  0x2a   : > { %786 = vmatpush3.bf16.msra.mxu1 %v785_v34  ;;  %v482_v49 = vld [vmem:[%s930_s12 + $0x28] sm:$0xff]  ;;  %v771_v50 = vpack.c.bf16 %v359_v44, %v357_v43  ;;  %v356_v51 = vld [vmem:[%s911_s8 + $0xa0] sm:$0xff]  ;;  %v358_v52 = vld [vmem:[%s911_s8 + $0xb0] sm:$0xff]  ;;  %v371_v36 = vshrl.u32 %v370_v35, 7 }
  0x2b   : > { %762 = vmatpush1.bf16.msra.mxu0 %v761_v20  ;;  %788 = vmatprep.subr.bf16.mxu1 %v787_v39  ;;  %v361_v53 = vld [vmem:[%s911_s8 + $0xc8] sm:$0xff]  ;;  %v363_v54 = vld [vmem:[%s911_s8 + $0xd8] sm:$0xff]  ;;  %v793_v55 = vpack.c.bf16 %v482_v49, %v481_v48  ;;  %v773_v56 = vpack.c.bf16 %v358_v52, %v356_v51  ;;  %v360_v58 = vld [vmem:[%s911_s8 + $0xc0] sm:$0xff] }
  0x2c   : > { %764 = vmatprep.subr.bf16.mxu0 %v763_v21  ;;  %v775_v57 = vpack.c.bf16 %v363_v54, %v361_v53  ;;  %v362_v59 = vld [vmem:[%s911_s8 + $0xd0] sm:$0xff]  ;;  %v365_v60 = vld [vmem:[%s911_s8 + $0xe8] sm:$0xff]  ;;  %v367_v61 = vld [vmem:[%s911_s8 + $0xf8] sm:$0xff]  ;;  %v372_v37 = vsub.s32 0, %v371_v36  ;;  %v376_v39 = vsub.s32 1, %v371_v36 }
  0x2d   : > { %v777_v62 = vpack.c.bf16 %v362_v59, %v360_v58  ;;  %v779_v63 = vpack.c.bf16 %v367_v61, %v365_v60  ;;  %v364_v1 = vld [vmem:[%s911_s8 + $0xe0] sm:$0xff]  ;;  %v366_v2 = vld [vmem:[%s911_s8 + $0xf0] sm:$0xff]  ;;  %v335_v5 = vld [vmem:[%s301_s17 + $0x8] sm:$0xff] }
  0x2e   : > { %790 = vmatpush3.bf16.msra.mxu1 %v789_v45  ;;  %v781_v3 = vpack.c.bf16 %v366_v2, %v364_v1  ;;  %v334_v4 = vld [vmem:[%s301_s17] sm:$0xff]  ;;  %v499_v6 = vld [vmem:[%s930_s12 + $0xb0] sm:$0xff]  ;;  %v500_v7 = vld [vmem:[%s930_s12 + $0xb8] sm:$0xff] }
  0x2f   : > { %766 = vmatpush1.bf16.msra.mxu0 %v765_v32  ;;  %792 = vmatprep.subr.bf16.mxu1 %v791_v47  ;;  %v795_v8 = vpack.c.bf16 %v500_v7, %v499_v6  ;;  %v483_v9 = vld [vmem:[%s930_s12 + $0x30] sm:$0xff]  ;;  %v484_v10 = vld [vmem:[%s930_s12 + $0x38] sm:$0xff]  ;;  %v501_v12 = vld [vmem:[%s930_s12 + $0xc0] sm:$0xff] }
  0x30   : > { %768 = vmatprep.subr.bf16.mxu0 %v767_v38  ;;  %v797_v11 = vpack.c.bf16 %v484_v10, %v483_v9  ;;  %v502_v13 = vld [vmem:[%s930_s12 + $0xc8] sm:$0xff]  ;;  %v503_v17 = vld [vmem:[%s930_s12 + $0xd0] sm:$0xff]  ;;  %v504_v18 = vld [vmem:[%s930_s12 + $0xd8] sm:$0xff] }
  0x31   : > { %v799_v14 = vpack.c.bf16 %v502_v13, %v501_v12  ;;  %v486_v15 = vld [vmem:[%s930_s12 + $0x48] sm:$0xff]  ;;  %v803_v19 = vpack.c.bf16 %v504_v18, %v503_v17  ;;  %v487_v20 = vld [vmem:[%s930_s12 + $0x50] sm:$0xff]  ;;  %v488_v21 = vld [vmem:[%s930_s12 + $0x58] sm:$0xff] }
  0x32   : > { %794 = vmatpush3.bf16.msra.mxu1 %v793_v55  ;;  %v805_v22 = vpack.c.bf16 %v488_v21, %v487_v20  ;;  %v505_v23 = vld [vmem:[%s930_s12 + $0xe0] sm:$0xff]  ;;  %v506_v24 = vld [vmem:[%s930_s12 + $0xe8] sm:$0xff]  ;;  %v507_v29 = vld [vmem:[%s930_s12 + $0xf0] sm:$0xff] }
  0x33   : > { %770 = vmatpush1.bf16.msra.mxu0 %v769_v46  ;;  %796 = vmatprep.subr.bf16.mxu1 %v795_v8  ;;  %v807_v25 = vpack.c.bf16 %v506_v24, %v505_v23  ;;  %v489_v26 = vld [vmem:[%s930_s12 + $0x60] sm:$0xff]  ;;  %v490_v27 = vld [vmem:[%s930_s12 + $0x68] sm:$0xff]  ;;  %v508_v30 = vld [vmem:[%s930_s12 + $0xf8] sm:$0xff] }
  0x34   : > { %772 = vmatprep.subr.bf16.mxu0 %v771_v50  ;;  %v809_v28 = vpack.c.bf16 %v490_v27, %v489_v26  ;;  %v811_v31 = vpack.c.bf16 %v508_v30, %v507_v29  ;;  %v491_v32 = vld [vmem:[%s930_s12 + $0x70] sm:$0xff]  ;;  %v492_v33 = vld [vmem:[%s930_s12 + $0x78] sm:$0xff]  ;;  %v368_v38 = vld [vmem:[%s314_s22] sm:$0x3] }
  0x35   : > { %v813_v34 = vpack.c.bf16 %v492_v33, %v491_v32  ;;  %v373_v40 = vrot.slane %v368_v38, %v372_v37  ;;  %v377_v41 = vrot.slane %v368_v38, %v376_v39  ;;  %v708_v8 = vld [vmem:[%s326_s27] ss:$0 sm:$0xff] }
  0x36   : > { %798 = vmatpush3.bf16.msra.mxu1 %v797_v11 }
  0x37   : > { %774 = vmatpush1.bf16.msra.mxu0 %v773_v56  ;;  %800 = vmatprep.subr.bf16.mxu1 %v799_v14 }
  0x38   : > { %776 = vmatprep.subr.bf16.mxu0 %v775_v57 }
  0x3b   : > { %778 = vmatpush1.bf16.msra.mxu0 %v777_v62 }
  0x3c   : > { %780 = vmatprep.subr.bf16.mxu0 %v779_v63 }
  0x3f   : > { %782 = vmatpush1.bf16.msra.mxu0 %v781_v3 }
  0x42   : > { %445 = vmatmul.mubr.f32.vlgmr.msra.gmra.mrb[0].mxu0 %v334_v4 }
  0x43   : > { %450 = vmatprep.mubr.f32.mxu0 %v856_v0  ;;  %v485_v0 = vld [vmem:[%s930_s12 + $0x40] sm:$0xff] }
  0x44   : > { %v801_v16 = vpack.c.bf16 %v486_v15, %v485_v0 }
  0x46   : > { %451 = vmatmul.mubr.f32.gmra.mrb[2].mxu0 %v335_v5  ;;  %802 = vmatpush3.bf16.msra.mxu1 %v801_v16 }
  0x47   : > { %804 = vmatprep.subr.bf16.mxu1 %v803_v19 }
  0x4a   : > { %806 = vmatpush3.bf16.msra.mxu1 %v805_v22 }
  0x4b   : > { %808 = vmatprep.subr.bf16.mxu1 %v807_v25 }
  0x4e   : > { %810 = vmatpush3.bf16.msra.mxu1 %v809_v28 }
  0x4f   : > { %812 = vmatprep.subr.bf16.mxu1 %v811_v31 }
  0x52   : > { %814 = vmatpush3.bf16.msra.mxu1 %v813_v34 }
 0x115   : > { %v446_v42 = vpop.f32.mrb[0].mxu0 }
 0x116   : > { %v447_v43 = vadd.f32 %v446_v42, %v373_v40  ;;  %v448_v44 = vpop.f32.mrb[1].mxu0 }
 0x117   : > { %v449_v45 = vadd.f32 %v448_v44, %v377_v41 }
 0x118   : > { %v461_v46 = vmul.f32 0.70710677, %v447_v43  ;;  %v457_v59 = vmul.f32 0.5, %v447_v43 }
 0x119   : > { %v462_v47 = vmul.f32 0.70710677, %v449_v45  ;;  %v452_v48 = vpop.f32.mrb[2].mxu0  ;;  %v458_v57 = vmul.f32 0.5, %v449_v45 }
 0x11a   : > { %825 = verf.f32 %v461_v46  ;;  %v453_v49 = vadd.f32 %v452_v48, %v373_v40  ;;  %v454_v50 = vpop.f32.mrb[3].mxu0 }
 0x11b   : > { %827 = verf.f32 %v462_v47  ;;  %v455_v51 = vadd.f32 %v454_v50, %v377_v41 }
 0x11c   : > { %v463_v52 = vmul.f32 0.70710677, %v453_v49  ;;  %v459_v4 = vmul.f32 0.5, %v453_v49 }
 0x11d   : > { %v464_v53 = vmul.f32 0.70710677, %v455_v51  ;;  %v460_v2 = vmul.f32 0.5, %v455_v51 }
 0x11e   : > { %829 = verf.f32 %v463_v52 }
 0x11f   : > { %831 = verf.f32 %v464_v53 }
 0x124   : > { %v826_v54 = vpop.eup %825 }
 0x125   : > { %v828_v55 = vpop.eup %827  ;;  %v469_v56 = vadd.f32 1.0, %v826_v54 }
 0x126   : > { %v470_v58 = vadd.f32 1.0, %v828_v55 }
 0x127   : > { %v473_v1 = vmul.f32 %v469_v56, %v457_v59 }
 0x128   : > { %v830_v60 = vpop.eup %829  ;;  %v474_v61 = vmul.f32 %v470_v58, %v458_v57 }
 0x129   : > { %v832_v62 = vpop.eup %831  ;;  %v471_v63 = vadd.f32 1.0, %v830_v60 }
 0x12a   : > { %v472_v3 = vadd.f32 1.0, %v832_v62  ;;  %580 = vmatprep.mubr.f32.mxu1 %v474_v61 }
 0x12b   : > { %581 = vmatmul.mubr.f32.vlgmr.msra.gmra.mrb[0].mxu1 %v473_v1  ;;  %v475_v6 = vmul.f32 %v471_v63, %v459_v4 }
 0x12c   : > { %v476_v5 = vmul.f32 %v472_v3, %v460_v2 }
 0x12e   : > { %585 = vmatprep.mubr.f32.mxu1 %v476_v5 }
 0x12f   : > { %586 = vmatmul.mubr.f32.gmra.mrb[2].mxu1 %v475_v6 }
 0x1fe   : > { %v745_v7 = vpop.f32.mrb[0].mxu1 }
 0x1ff   : > { %v746_v9 = vpop.f32.mrb[1].mxu1 }
 0x200   : > { %v747_v10 = vadd.f32 %v746_v9, %v745_v7 }
 0x202   : > { %v583_v11 = vadd.f32 %v747_v10, %v708_v8  ;;  %v748_v12 = vpop.f32.mrb[2].mxu1 }
 0x203   : > { %v749_v13 = vpop.f32.mrb[3].mxu1 }
 0x204   : > { %591 = vst [vmem:[%s332_s30] sm:$0xff] %v583_v11  ;;  %v750_v14 = vadd.f32 %v749_v13, %v748_v12 }
 0x206   : > { %v588_v0 = vadd.f32 %v750_v14, %v708_v8 }
 0x208   : > { %592 = vst [vmem:[%s332_s30 + $0x8] sm:$0xff] %v588_v0 }
 0x209 PF: > { %s22_s26 = sadd.s32 1, %s853_s26  }
 0x20a   : > { %p19_p13 = scmp.ge.s32.totalorder %s22_s26, 8  }
 0x20c   :  { %21 = sbr.rel (!%p19_p13) target bundleno = 16 (0x10), region = 82 }

</bundles_post_ra>
